<compile_context>
chip_gen: v7x
topology: tpu7x:2x2x1
jax: 0.10.0
libtpu: 0.0.40
codegen_flags: <defaults>
</compile_context>

<pallas_src>
import functools

import numpy as np

import jax
import jax.numpy as jnp
from jax.experimental import pallas as pl
from jax.experimental.pallas import tpu as pltpu


# ---------------------------------------------------------------------------
# Generation-aware configuration
# ---------------------------------------------------------------------------
TM_PREF = 512          # message-passing / linear row tile preference
TN_PREF = 512          # message-passing column (reduction) tile preference


def _device_kind():
    try:
        return jax.devices()[0].device_kind.lower()
    except Exception:
        return ""


_KIND = _device_kind()

# bf16 VPU/EUP exist on v6e/v7x; keep the f32 elementwise path elsewhere (v5e
# and older have no bf16 VPU/EUP).
_EW_DTYPE = (jnp.bfloat16
             if (("v6" in _KIND) or ("v7" in _KIND) or ("7x" in _KIND))
             else jnp.float32)


def _vmem_limit_bytes():
    cap = 128 * 1024 * 1024
    try:
        cap = int(pltpu.get_tpu_info().vmem_capacity_bytes)
    except Exception:
        pass
    if ("v7" in _KIND) or ("7x" in _KIND):
        cap = min(cap, 64 * 1024 * 1024)         # v7x: 64 MiB physical per TC
    # Leave headroom for double-buffered DMA blocks + compiler scratch.
    return min((cap * 3) // 4, 100 * 1024 * 1024)


_VMEM_LIMIT = _vmem_limit_bytes()


def _cparams(dims):
    return pltpu.CompilerParams(dimension_semantics=dims,
                                vmem_limit_bytes=_VMEM_LIMIT)


def _round_up(a, m):
    return ((a + m - 1) // m) * m


def _divisor_tile(n, pref):
    """Largest tile <= pref dividing n that is a multiple of 8, else full n."""
    for t in range(min(pref, n), 0, -1):
        if n % t == 0 and t % 8 == 0:
            return t
    return n


# ---------------------------------------------------------------------------
# Linear (+ReLU) kernel
# ---------------------------------------------------------------------------
def _linear_kernel(x_ref, w_ref, b_ref, o_ref, *, act):
    y = jnp.dot(x_ref[...].astype(jnp.bfloat16),
                w_ref[...].astype(jnp.bfloat16),
                preferred_element_type=jnp.float32) + b_ref[...]
    if act == "relu":
        y = jnp.maximum(y, 0.0)
    o_ref[...] = y.astype(o_ref.dtype)


def linear(x, w, b, act="none", out_dtype=jnp.float32):
    n, din = x.shape
    dout = w.shape[1]
    tm = _divisor_tile(n, TM_PREF)
    return pl.pallas_call(
        functools.partial(_linear_kernel, act=act),
        out_shape=jax.ShapeDtypeStruct((n, dout), out_dtype),
        grid_spec=pltpu.PrefetchScalarGridSpec(
            num_scalar_prefetch=0,
            grid=(n // tm,),
            in_specs=[pl.BlockSpec((tm, din), lambda i: (i, 0)),
                      pl.BlockSpec((din, dout), lambda i: (0, 0)),
                      pl.BlockSpec((1, dout), lambda i: (0, 0))],
            out_specs=pl.BlockSpec((tm, dout), lambda i: (i, 0))),
        compiler_params=_cparams(("parallel",)),
    )(x, w, b)


# ---------------------------------------------------------------------------
# Message-passing kernel (block-sparse adjacency, DMA-level zero-block skip)
# ---------------------------------------------------------------------------
def _mp_kernel(col_ref, nnz_ref, x_ref, h_ref, h1_ref, adj_ref, a_ref, o_ref,
               num_acc, div_acc, x1_scr, w2_scr, *, ew_dtype):
    """Grid step (i, j): row block i, j-th *nonzero* column block of row i.

    Dense-block form of the edge-list scatter:
        w1[r,c] = A[r,c] * exp(lrelu(x1[r] + h1[c]))
        out[r]  = (sum_c w1[r,c] h[c] + w2[r] x[r]) / (sum_c w1[r,c] + w2[r])
    The j axis ("arbitrary", last) walks only the nonzero column blocks of the
    row block (data-dependent index_maps via scalar prefetch), so zero blocks
    cost neither DMA nor compute.  num/div accumulate in f32 VMEM scratch.
    """
    i = pl.program_id(0)
    j = pl.program_id(1)

    def lrelu(v):
        return jnp.where(v > 0, v, 0.2 * v)

    @pl.when(j == 0)
    def _init():
        num_acc[...] = jnp.zeros_like(num_acc)
        div_acc[...] = jnp.zeros_like(div_acc)
        # Hoisted projections: one fused MXU push per row tile (not per (i,j)).
        xp = jax.lax.dot_general(x_ref[...], a_ref[...].astype(jnp.bfloat16),
                                 (((1,), (1,)), ((), ())),
                                 preferred_element_type=jnp.float32)   # (tm, 2)
        x1_scr[...] = xp[:, 0:1]
        w2_scr[...] = jnp.exp(lrelu(xp[:, 0:1] + xp[:, 1:2]))

    # Only valid entries of the compacted nonzero-block list contribute.
    @pl.when(j < nnz_ref[i])
    def _accumulate():
        h_b = h_ref[...]                                   # (tn, hid) bf16
        x1 = x1_scr[...].astype(ew_dtype)                  # (tm, 1)
        h1 = h1_ref[...].astype(ew_dtype)                  # (1, tn)
        e = jnp.exp(lrelu(x1 + h1))                        # (tm, tn) ew_dtype
        if ew_dtype == jnp.bfloat16:
            w1_b = adj_ref[...] * e                        # bf16 end-to-end
        else:  # v5e path: f32 elementwise, bf16 only for the MXU operands
            w1_b = (adj_ref[...].astype(jnp.float32) * e).astype(jnp.bfloat16)
        # Row sum via MXU dot with a ones column (off the XLU, f32 accumulate).
        ones = jnp.ones((h_b.shape[0], 1), jnp.bfloat16)
        div_acc[...] += jnp.dot(w1_b, ones, preferred_element_type=jnp.float32)
        num_acc[...] += jnp.dot(w1_b, h_b, preferred_element_type=jnp.float32)

    @pl.when(j == pl.num_programs(1) - 1)
    def _finalize():
        w2 = w2_scr[...]
        num = num_acc[...] + w2 * x_ref[...].astype(jnp.float32)
        div = div_acc[...] + w2
        o_ref[...] = (num * pl.reciprocal(div, approx=True)).astype(o_ref.dtype)


def message_passing(x, h, a_row, g):
    """x: (Ns, H) bf16 source feats, h: (Nt, H) bf16 target hidden,
    a_row: (2, H) f32 attention weights, g: prepared graph dict."""
    ns, hid = x.shape
    nt = h.shape[0]
    tm, tn = g["tm"], g["tn"]
    ns_p, nt_p = g["ns_pad"], g["nt_pad"]
    gi = ns_p // tm
    mn = g["max_nnz"]

    if ns_p != ns:
        x = jnp.pad(x, ((0, ns_p - ns), (0, 0)))
    if nt_p != nt:
        h = jnp.pad(h, ((0, nt_p - nt), (0, 0)))
    # Hoisted: h1 = h @ a2, lane-dense (1, Nt_pad), fed via a (1, tn) BlockSpec.
    h1 = jnp.dot(h.astype(jnp.float32), a_row[1]).reshape(1, nt_p)

    out = pl.pallas_call(
        functools.partial(_mp_kernel, ew_dtype=_EW_DTYPE),
        out_shape=jax.ShapeDtypeStruct((ns_p, hid), jnp.bfloat16),
        grid_spec=pltpu.PrefetchScalarGridSpec(
            num_scalar_prefetch=2,                # compacted col ids + counts
            grid=(gi, mn),
            in_specs=[
                pl.BlockSpec((tm, hid), lambda i, j, col, nnz: (i, 0)),
                pl.BlockSpec((tn, hid),
                             lambda i, j, col, nnz: (col[i * mn + j], 0)),
                pl.BlockSpec((1, tn),
                             lambda i, j, col, nnz: (0, col[i * mn + j])),
                pl.BlockSpec((tm, tn),
                             lambda i, j, col, nnz: (i, col[i * mn + j])),
                pl.BlockSpec((2, hid), lambda i, j, col, nnz: (0, 0)),
            ],
            out_specs=pl.BlockSpec((tm, hid), lambda i, j, col, nnz: (i, 0)),
            scratch_shapes=[pltpu.VMEM((tm, hid), jnp.float32),   # num
                            pltpu.VMEM((tm, 1), jnp.float32),     # div
                            pltpu.VMEM((tm, 1), jnp.float32),     # x1 (hoisted)
                            pltpu.VMEM((tm, 1), jnp.float32)]),   # w2 (hoisted)
        compiler_params=_cparams(("parallel", "arbitrary")),
    )(g["col_ids"], g["nnz"], x, h, h1, g["adj"], a_row)
    return out[:ns] if ns_p != ns else out


# ---------------------------------------------------------------------------
# Semantic attention (HAN-style), split into score + combine kernels
# ---------------------------------------------------------------------------
def _make_sem_score_kernel(num_m, inv_n):
    """Phase 1: per-metapath mean score (grid reduction over node tiles)."""
    def kernel(*refs):
        z_refs = refs[:num_m]
        w1_ref, b1_ref, w2_ref, s_ref = refs[num_m:num_m + 4]

        @pl.when(pl.program_id(0) == 0)
        def _init():
            s_ref[...] = jnp.zeros_like(s_ref)

        w1 = w1_ref[...].astype(jnp.bfloat16)
        b1 = b1_ref[...]
        w2 = w2_ref[...].astype(jnp.bfloat16)
        parts = []
        for m in range(num_m):
            z = z_refs[m][...]                                       # bf16
            p = jnp.tanh(jnp.dot(z, w1, preferred_element_type=jnp.float32) + b1)
            s = jnp.dot(p.astype(jnp.bfloat16), w2,
                        preferred_element_type=jnp.float32)          # (tm, 1)
            parts.append(jnp.sum(s, axis=0, keepdims=True))          # (1, 1)
        s_ref[...] += jnp.concatenate(parts, axis=1)                 # (1, M)

        @pl.when(pl.program_id(0) == pl.num_programs(0) - 1)
        def _finalize():
            s_ref[...] = s_ref[...] * inv_n                          # sum -> mean
    return kernel


def semantic_scores(z_list, w1, b1, w2):
    m = len(z_list)
    n, hid = z_list[0].shape
    hs = w1.shape[1]
    tm = _divisor_tile(n, TM_PREF)
    in_specs = [pl.BlockSpec((tm, hid), lambda i: (i, 0)) for _ in range(m)]
    in_specs += [pl.BlockSpec((hid, hs), lambda i: (0, 0)),
                 pl.BlockSpec((1, hs), lambda i: (0, 0)),
                 pl.BlockSpec((hs, 1), lambda i: (0, 0))]
    return pl.pallas_call(
        _make_sem_score_kernel(m, 1.0 / n),
        out_shape=jax.ShapeDtypeStruct((1, m), jnp.float32),
        grid_spec=pltpu.PrefetchScalarGridSpec(
            num_scalar_prefetch=0,
            grid=(n // tm,),
            in_specs=in_specs,
            out_specs=pl.BlockSpec((1, m), lambda i: (0, 0))),
        compiler_params=_cparams(("arbitrary",)),
    )(*z_list, w1, b1, w2)


def _make_sem_combine_kernel(num_m):
    """Phase 2: softmax(beta)-weighted sum of metapath embeddings + ELU."""
    def kernel(*refs):
        z_refs = refs[:num_m]
        s_ref, o_ref = refs[num_m], refs[num_m + 1]
        beta = jax.nn.softmax(s_ref[...], axis=1)                    # (1, M)
        out = beta[:, 0:1] * z_refs[0][...].astype(jnp.float32)
        for m in range(1, num_m):
            out = out + beta[:, m:m + 1] * z_refs[m][...].astype(jnp.float32)
        # ELU(alpha=1); clamp exp arg so the unselected branch never overflows.
        o_ref[...] = jnp.where(out > 0, out,
                               jnp.exp(jnp.minimum(out, 0.0)) - 1.0
                               ).astype(o_ref.dtype)
    return kernel


def semantic_combine_elu(z_list, scores):
    m = len(z_list)
    n, hid = z_list[0].shape
    tm = _divisor_tile(n, TM_PREF)
    in_specs = [pl.BlockSpec((tm, hid), lambda i: (i, 0)) for _ in range(m)]
    in_specs += [pl.BlockSpec((1, m), lambda i: (0, 0))]
    return pl.pallas_call(
        _make_sem_combine_kernel(m),
        out_shape=jax.ShapeDtypeStruct((n, hid), jnp.bfloat16),
        grid_spec=pltpu.PrefetchScalarGridSpec(
            num_scalar_prefetch=0,
            grid=(n // tm,),
            in_specs=in_specs,
            out_specs=pl.BlockSpec((tm, hid), lambda i: (i, 0))),
        compiler_params=_cparams(("parallel",)),
    )(*z_list, scores)


# ---------------------------------------------------------------------------
# Graph preprocessing & parameter init (deterministic, in-script)
# ---------------------------------------------------------------------------
def prepare_adjacency(adj_f32, tm_pref=TM_PREF, tn_pref=TN_PREF):
    """Pad to tile multiples, cast to bf16, and build the compacted per-row-block
    list of nonzero column blocks used for DMA-level zero-block skipping."""
    ns, nt = adj_f32.shape
    tm = tm_pref if ns > tm_pref else _round_up(ns, 8)
    tn = tn_pref if nt > tn_pref else _round_up(nt, 128)
    ns_p, nt_p = _round_up(ns, tm), _round_up(nt, tn)
    gi, gk = ns_p // tm, nt_p // tn

    adj_p = adj_f32
    if (ns_p, nt_p) != (ns, nt):
        adj_p = jnp.zeros((ns_p, nt_p), adj_f32.dtype).at[:ns, :nt].set(adj_f32)

    blocks = np.asarray(adj_p).reshape(gi, tm, gk, tn)
    nz = np.abs(blocks).sum(axis=(1, 3)) > 0                          # (gi, gk)
    cols = [np.nonzero(nz[r])[0] for r in range(gi)]
    max_nnz = max(1, max((len(c) for c in cols), default=1))
    col_ids = np.zeros((gi, max_nnz), np.int32)
    nnz = np.zeros((gi,), np.int32)
    for r, c in enumerate(cols):
        nnz[r] = len(c)
        if len(c):
            col_ids[r, :len(c)] = c
            col_ids[r, len(c):] = c[-1]   # repeat last -> Pallas skips the re-fetch

    return dict(
        adj=adj_p.astype(jnp.bfloat16),   # edge multiplicities exact in bf16 <= 256
        col_ids=jnp.asarray(col_ids.reshape(-1)),
        nnz=jnp.asarray(nnz),
        tm=tm, tn=tn, max_nnz=max_nnz,
        ns=ns, nt=nt, ns_pad=ns_p, nt_pad=nt_p)


def init_params(key, n_in_dict, n_hid, n_out, edge_types, hop, sem_hidden=128):
    params = {"fc1": {}, "attn": [], "sem": []}
    keys = iter(jax.random.split(key, 4096))

    for nt, din in n_in_dict.items():
        w = jax.random.normal(next(keys), (din, n_hid), jnp.float32) * 0.1
        b = jax.random.normal(next(keys), (1, n_hid), jnp.float32) * 0.1
        params["fc1"][nt] = (w, b)

    for _ in range(hop):  # layerwise=True
        attn, sem = {}, {}
        for et in edge_types:
            name = "_".join(et)
            # rows = [a1^T ; a2^T] so both projections fuse into one MXU push
            attn[name] = jax.random.normal(next(keys), (2, n_hid), jnp.float32) * 0.1
        for nt in n_in_dict:
            sw1 = jax.random.normal(next(keys), (n_hid, sem_hidden), jnp.float32) * 0.1
            sb1 = jax.random.normal(next(keys), (1, sem_hidden), jnp.float32) * 0.1
            sw2 = jax.random.normal(next(keys), (sem_hidden, 1), jnp.float32) * 0.1
            sem[nt] = (sw1, sb1, sw2)
        params["attn"].append(attn)
        params["sem"].append(sem)

    wf = jax.random.normal(next(keys), (n_hid, n_out), jnp.float32) * 0.1
    bf = jax.random.normal(next(keys), (1, n_out), jnp.float32) * 0.1
    params["fc2"] = (wf, bf)
    return params


# ---------------------------------------------------------------------------
# Pallas-backed forward
# ---------------------------------------------------------------------------
def hetgtan_forward(params, x_dict_in, graph, edge_types, hop, target_node_type):
    # fc1 + relu; dropouts are identity in eval mode.  Activations kept in bf16
    # between kernels (f32 accumulation inside) to halve the HBM streams.
    x_dict = {}
    for nt, x in x_dict_in.items():
        w, b = params["fc1"][nt]
        x_dict[nt] = linear(x, w, b, act="relu", out_dtype=jnp.bfloat16)
    h_dict = dict(x_dict)

    for i in range(hop):
        sem_emb = {nt: [] for nt in x_dict}
        for et in edge_types:
            name = "_".join(et)
            nts, ntt = et[0], et[-1]
            a_row = params["attn"][i][name]
            sem_emb[nts].append(
                message_passing(x_dict[nts], h_dict[ntt], a_row, graph[et]))
        new_h = {}
        for nt in x_dict:
            sw1, sb1, sw2 = params["sem"][i][nt]
            scores = semantic_scores(sem_emb[nt], sw1, sb1, sw2)   # (1, M)
            new_h[nt] = semantic_combine_elu(sem_emb[nt], scores)
        h_dict.update(new_h)

    wf, bf = params["fc2"]
    return linear(h_dict[target_node_type], wf, bf, act="none",
                  out_dtype=jnp.float32)


# ---------------------------------------------------------------------------
# Pure-JAX reference (edge-list scatter, full f32) to validate the kernels
# ---------------------------------------------------------------------------
def ref_forward(params, x_dict_in, edge_index_dict, edge_types, hop,
                target_node_type):
    def lrelu(v):
        return jnp.where(v > 0, v, 0.2 * v)

    x_dict = {}
    for nt, x in x_dict_in.items():
        w, b = params["fc1"][nt]
        x_dict[nt] = jnp.maximum(x @ w + b, 0.0)
    h_dict = dict(x_dict)

    for i in range(hop):
        sem_emb = {nt: [] for nt in x_dict}
        for et in edge_types:
            name = "_".join(et)
            nts, ntt = et[0], et[-1]
            s, t = edge_index_dict[et]
            x, h = x_dict[nts], h_dict[ntt]
            n = x.shape[0]
            a_row = params["attn"][i][name]                       # (2, H)
            proj = x @ a_row.T                                    # (N, 2)
            x1, x2 = proj[:, 0:1], proj[:, 1:2]
            h1 = h @ a_row[1:2].T                                 # (Nt, 1)
            w2 = jnp.exp(lrelu(x1 + x2))
            w1 = jnp.exp(lrelu(x1[s] + h1[t]))
            div = jax.ops.segment_sum(w1, s, num_segments=n) + w2
            hn = jax.ops.segment_sum(w1 * h[t], s, num_segments=n) + w2 * x
            sem_emb[nts].append(hn / div)
        new_h = {}
        for nt in x_dict:
            z = jnp.stack(sem_emb[nt], axis=1)                    # (N, M, H)
            sw1, sb1, sw2 = params["sem"][i][nt]
            wsc = jnp.tanh(z @ sw1 + sb1) @ sw2                   # (N, M, 1)
            beta = jax.nn.softmax(jnp.mean(wsc, axis=0), axis=0)  # (M, 1)
            out = jnp.sum(beta[None] * z, axis=1)                 # (N, H)
            new_h[nt] = jnp.where(out > 0, out,
                                  jnp.exp(jnp.minimum(out, 0.0)) - 1.0)
        h_dict.update(new_h)

    wf, bf = params["fc2"]
    return h_dict[target_node_type] @ wf + bf


# ---------------------------------------------------------------------------
if __name__ == "__main__":
    key = jax.random.PRNGKey(0)

    # Synthetic heterogeneous graph; sizes give >=2 row blocks at TM=512 (v7x
    # megacore) and an all-zero adjacency block region (exercises DMA skip).
    n_in_dict = {"paper": 32, "author": 24}
    n_nodes = {"paper": 1024, "author": 512}
    n_hid, n_out, hop = 128, 8, 2
    edge_types = (
        ("paper", "pa", "author"),
        ("author", "ap", "paper"),
        ("paper", "pp", "paper"),
    )

    kx, ke, kp = jax.random.split(key, 3)

    x_dict = {}
    for j, (nt, din) in enumerate(n_in_dict.items()):
        x_dict[nt] = jax.random.normal(
            jax.random.fold_in(kx, j), (n_nodes[nt], din), jnp.float32)

    # pp edges confined to the first 512x512 block so 3 of its 4 adjacency
    # tiles are all-zero and never even DMA'd (compacted nonzero-block list).
    edge_spec = {
        edge_types[0]: (600, n_nodes["paper"], n_nodes["author"]),
        edge_types[1]: (600, n_nodes["author"], n_nodes["paper"]),
        edge_types[2]: (400, 512, 512),
    }

    edge_index_dict, graph = {}, {}
    for j, et in enumerate(edge_types):
        ne, smax, tmax = edge_spec[et]
        ks, kt = jax.random.split(jax.random.fold_in(ke, j))
        s = jax.random.randint(ks, (ne,), 0, smax)
        t = jax.random.randint(kt, (ne,), 0, tmax)
        edge_index_dict[et] = (s, t)
        ns_, nt_ = n_nodes[et[0]], n_nodes[et[-1]]
        adj = jnp.zeros((ns_, nt_), jnp.float32).at[s, t].add(1.0)
        graph[et] = prepare_adjacency(adj)

    params = init_params(kp, n_in_dict, n_hid, n_out, edge_types, hop)

    out = hetgtan_forward(params, x_dict, graph, edge_types, hop, "paper")
    out = jax.block_until_ready(out)

    ref = ref_forward(params, x_dict, edge_index_dict, edge_types, hop, "paper")
    ref = jax.block_until_ready(ref)

    assert out.shape == (n_nodes["paper"], n_out), out.shape
    max_err = float(jnp.max(jnp.abs(out - ref)))
    # Tolerance covers bf16 MXU operands, bf16 inter-kernel activations,
    # bf16 elementwise (v6e/v7x) and the approximate EUP reciprocal.
    assert jnp.allclose(out, ref, rtol=7.5e-2, atol=7.5e-2), f"max_err={max_err}"

    print("KERNEL_OK")
</pallas_src>

<mosaic_0001>
module attributes {stable_mosaic.version = 11 : i64} {
  func.func @_linear_kernel(%arg0: i32, %arg1: memref<512x32xf32, #tpu.memory_space<vmem>>, %arg2: memref<32x128xf32, #tpu.memory_space<vmem>>, %arg3: memref<1x128xf32, #tpu.memory_space<vmem>>, %arg4: memref<512x128xbf16, #tpu.memory_space<vmem>>) attributes {dimension_semantics = [#tpu.dimension_semantics<parallel>], iteration_bounds = array<i64: 2>, scalar_prefetch = 0 : i64, scratch_operands = 0 : i64, tpu.core_type = #tpu.core_type<tc>, window_params = [{transform_indices = @transform_0, window_bounds = array<i64: 512, 32>}, {pipeline_mode = #tpu.pipeline_mode<synchronous>, transform_indices = @transform_1, window_bounds = array<i64: 32, 128>}, {pipeline_mode = #tpu.pipeline_mode<synchronous>, transform_indices = @transform_2, window_bounds = array<i64: 1, 128>}, {transform_indices = @transform_3, window_bounds = array<i64: 512, 128>}]} {
    %c0 = arith.constant 0 : index
    %c0_0 = arith.constant 0 : index
    %0 = vector.load %arg1[%c0, %c0_0] : memref<512x32xf32, #tpu.memory_space<vmem>>, vector<512x32xf32>
    %1 = arith.truncf %0 : vector<512x32xf32> to vector<512x32xbf16>
    %c0_1 = arith.constant 0 : index
    %c0_2 = arith.constant 0 : index
    %2 = vector.load %arg2[%c0_1, %c0_2] : memref<32x128xf32, #tpu.memory_space<vmem>>, vector<32x128xf32>
    %3 = arith.truncf %2 : vector<32x128xf32> to vector<32x128xbf16>
    %cst = arith.constant dense<0.000000e+00> : vector<512x128xf32>
    %4 = tpu.matmul %1, %3, %cst {dimension_numbers = #tpu.dot_dimension_numbers<[1], [0], [0], [1], [0, 0, 1, 1], [], []>} : vector<512x32xbf16>, vector<32x128xbf16>, vector<512x128xf32> -> vector<512x128xf32>
    %c0_3 = arith.constant 0 : index
    %c0_4 = arith.constant 0 : index
    %5 = vector.load %arg3[%c0_3, %c0_4] : memref<1x128xf32, #tpu.memory_space<vmem>>, vector<1x128xf32>
    %6 = vector.broadcast %5 : vector<1x128xf32> to vector<512x128xf32>
    %7 = arith.addf %4, %6 : vector<512x128xf32>
    %cst_5 = arith.constant 0.000000e+00 : f32
    %8 = vector.broadcast %cst_5 : f32 to vector<512x128xf32>
    %9 = arith.maximumf %7, %8 : vector<512x128xf32>
    %10 = arith.truncf %9 : vector<512x128xf32> to vector<512x128xbf16>
    %c0_6 = arith.constant 0 : index
    %c0_7 = arith.constant 0 : index
    %11 = vector.load %arg4[%c0_6, %c0_7] : memref<512x128xbf16, #tpu.memory_space<vmem>>, vector<512x128xbf16>
    tpu.vector_store %arg4[%c0_6, %c0_7], %10 {strides = array<i32>} : memref<512x128xbf16, #tpu.memory_space<vmem>>, vector<512x128xbf16>,
    return
  }
  func.func @transform_0(%arg0: i32) -> (i32, i32) {
    %c0_i32 = arith.constant 0 : i32
    %c0_i32_0 = arith.constant 0 : i32
    return %arg0, %c0_i32 : i32, i32
  }
  func.func @transform_1(%arg0: i32) -> (i32, i32) {
    %c0_i32 = arith.constant 0 : i32
    %c0_i32_0 = arith.constant 0 : i32
    %c0_i32_1 = arith.constant 0 : i32
    return %c0_i32, %c0_i32_0 : i32, i32
  }
  func.func @transform_2(%arg0: i32) -> (i32, i32) {
    %c0_i32 = arith.constant 0 : i32
    %c0_i32_0 = arith.constant 0 : i32
    %c0_i32_1 = arith.constant 0 : i32
    return %c0_i32, %c0_i32_0 : i32, i32
  }
  func.func @transform_3(%arg0: i32) -> (i32, i32) {
    %c0_i32 = arith.constant 0 : i32
    %c0_i32_0 = arith.constant 0 : i32
    return %arg0, %c0_i32 : i32, i32
  }
}

</mosaic_0001>

<bundles_post_ra>
// kernel: tpu_custom_call.1
= control target key start
LH: loop header
LB: loop body
LE: loop exit
PB: predicated region body
PF: predicated region fallthrough
CT: control target
= control target key end

     0   :  { %8 = vsyncpa [#allocation3], 0  ;;  %s2380_s0 = inlined_call_operand.hbm [shape: f32[1024,32], index: 0, kind: input, shape index: {}]   ;;  %s2381_s1 = inlined_call_operand.hbm [shape: f32[32,128], index: 1, kind: input, shape index: {}]   ;;  %s2382_s2 = inlined_call_operand.hbm [shape: f32[1,128], index: 2, kind: input, shape index: {}]   ;;  %s2383_s3 = inlined_call_operand.hbm [shape: bf16[1024,128], index: 3, kind: output, shape index: {}]  }
   0x1   :  { %10 = vsyncpa [#allocation3 + $0x1], 0 }
   0x2   :  { %11 = vsyncpa [#allocation6], 0 }
   0x3   :  { %12 = vsyncpa [#allocation4], 0 }
   0x4   :  { %14 = vsyncpa [#allocation4 + $0x1], 0  ;;  %s1939_s12 = smov 0   ;;  %s1941_s13 = smov 0  }
   0x5   :  { %s1943_s14 = smov 0   ;;  %s1945_s15 = smov 0  }
   0x6 LB: > { %s1960_s16 = sadd.s32 4294967295, %s1909_s15   ;;  %s1204_s17 = sadd.s32 4294967294, %s1909_s15   ;;  %s1909_s15 = sphi %s1945_s15, %s2403_s15   ;;  %s1905_s14 = sphi %s1943_s14, %s2402_s14   ;;  %s1901_s13 = sphi %s1941_s13, %s2401_s13   ;;  %s1897_s12 = sphi %s1939_s12, %s2400_s12  }
   0x7   : > { %p40_p0 = scmp.ne.s32.totalorder %s1901_s13, %s1897_s12  ;;  %p2384_p1 = scmp.eq.s32.totalorder %s1960_s16, 0 }
   0x8   : > { %p112_p3 = scmp.eq.s32.totalorder %s1204_s17, 1  ;;  %p1205_p5 = scmp.ge.s32.totalorder %s1909_s15, 1 }
   0x9   : > { %p1969_p4 = por %p2384_p1, %p40_p0  ;;  %p119_p7 = scmp.lt.s32.totalorder %s1909_s15, 3 }
   0xa   : > { %p1974_p6 = por %p112_p3, %p40_p0  ;;  %s1911_s21 = smov [#allocation5]  }
   0xb   : > { %s2387_s18 = scalar_select %p1969_p4, 1, 0 }
   0xc   : > { %s2388_s19 = scalar_select %p1974_p6, 1, 0 }
   0xd   : > { %p1979_p8 = pnand %p1205_p5, %p119_p7  ;;  %s131_s22 = sshll.u32 %s1911_s21, 4  ;;  %s1983_s22 = int_to_ptr.vmem [resolvable:$true] %s131_s22 }
   0xe   : > { %s1912_s24 = smov [#allocation7]   ;;  %s1753_s28 = scalar_lea.hbm %s2381_s1, 512 }
   0xf   : > { %p1694_p9 = pneg %p1979_p8  ;;  %s145_s25 = sshll.u32 %s1912_s24, 4  ;;  %s1994_s25 = int_to_ptr.vmem [resolvable:$true] %s145_s25 }
  0x10   : > { %p1754_p12 = scmp.ne.s32.totalorder %s2381_s1, %s1753_s28  ;;  %p1760_p5 = scmp.lt.u32.totalorder %s1753_s28, %s2381_s1 }
  0x11   : > { %p1990_p11 = pnand %p1694_p9, %p2384_p1 }
  0x13   : > { %p1755_p13 = pneg %p1990_p11 }
  0x15   : > { %p1756_p0 = pnand %p1755_p13, %p1754_p12 }
  0x17   : > { %p1757_p3 = pneg %p1756_p0 }
  0x19   : > { %p1762_p7 = pnand %p1760_p5, %p1757_p3 }
  0x1b   : > { %1765 = shalt.err (!%p1762_p7)
}
  0x1c   : > { %s1766_s6 = scalar_lea.vmem %s1983_s22, 512  ;;  %p1774_p2 = scmp.lt.s32.totalorder %s1983_s22, %s1983_s22 }
  0x1d   : > { %p1767_p9 = scmp.ne.s32.totalorder %s1983_s22, %s1766_s6  ;;  %p1775_p12 = scmp.lt.s32.totalorder %s1766_s6, %s1766_s6 }
  0x1f   : > { %p1769_p10 = pnand %p1767_p9, %p1755_p13  ;;  %p1776_p0 = por %p1775_p12, %p1774_p2 }
  0x21   : > { %p1770_p1 = pneg %p1769_p10 }
  0x23   : > { %p1777_p6 = pnand %p1776_p0, %p1770_p1 }
  0x25   : > { %1780 = shalt.err (!%p1777_p6)
}
  0x26   : > { %s1913_s7 = smov 128   ;;  %s1914_s8 = smov 8  }
  0x27   : > { %1697 = dma.hbm_to_vmem [thread:$0]  (!%p1990_p11), %s2381_s1, 512, %s1983_s22, [#allocation6], %s1913_s7, %s1913_s7, %s1914_s8  }
  0x28   : > { %s1781_s21 = scalar_lea.hbm %s2382_s2, 16 }
  0x29   : > { %p1782_p1 = scmp.ne.s32.totalorder %s2382_s2, %s1781_s21  ;;  %p1788_p10 = scmp.lt.u32.totalorder %s1781_s21, %s2382_s2 }
  0x2b   : > { %p1784_p2 = pnand %p1782_p1, %p1755_p13 }
  0x2d   : > { %p1785_p6 = pneg %p1784_p2 }
  0x2f   : > { %p1790_p3 = pnand %p1788_p10, %p1785_p6 }
  0x31   : > { %1793 = shalt.err (!%p1790_p3)
}
  0x32   : > { %s1794_s22 = scalar_lea.vmem %s1994_s25, 16  ;;  %s1801_s29 = scalar_lea.vmem %s1994_s25, 32 }
  0x33   : > { %p1795_p5 = scmp.ne.s32.totalorder %s1994_s25, %s1794_s22  ;;  %p1802_p12 = scmp.lt.s32.totalorder %s1994_s25, %s1994_s25 }
  0x34   : > { %p1803_p0 = scmp.lt.s32.totalorder %s1801_s29, %s1794_s22 }
  0x35   : > { %p1797_p7 = pnand %p1795_p5, %p1755_p13 }
  0x36   : > { %p1804_p1 = por %p1803_p0, %p1802_p12 }
  0x37   : > { %p1798_p9 = pneg %p1797_p7 }
  0x39   : > { %p1805_p2 = pnand %p1804_p1, %p1798_p9 }
  0x3b   : > { %1808 = shalt.err (!%p1805_p2)
}
  0x3c   : > { %1700 = dma.hbm_to_vmem [thread:$0]  (!%p1990_p11), %s2382_s2, 16, %s1994_s25, [#allocation6]  }
  0x3d   : > { %s2053_s5 = sadd.s32 1, %s1909_s15   ;;  %s27_s23 = sadd.s32 1, %s1905_s14 }
  0x3e   : > { %s24_s6 = ssub.s32 %s1909_s15, %s2053_s5  ;;  %p34_p13 = scmp.ne.s32.totalorder %s1905_s14, %s1901_s13 }
  0x3f   : > { %p25_p6 = scmp.eq.s32.totalorder %s24_s6, 0  ;;  %p35_p10 = scmp.eq.s32.totalorder %s1909_s15, 0 }
  0x40   : > { %p2391_p3 = scmp.eq.s32.totalorder %s1960_s16, 1  ;;  %p1711_p7 = scmp.lt.s32.totalorder %s1909_s15, 2 }
  0x41   : > { %s2069_s10 = scalar_select %p25_p6, %s1905_s14, %s27_s23  }
  0x42   : > { %p2063_p5 = por %p2391_p3, %p34_p13  ;;  %p36_p9 = por %p35_p10, %p34_p13 }
  0x43   : > { %s156_s11 = sand.u32 1, %s1905_s14   ;;  %s1319_s25 = sshll.u32 %s1909_s15, 13 }
  0x44   : > { %s2392_s9 = scalar_select %p2063_p5, 1, 0 }
  0x45   : > { %s1209_s17 = sshll.u32 %s156_s11, 9  ;;  %s2076_s26 = scalar_lea.hbm %s2380_s0, %s1319_s25 }
  0x46   : > { %s160_s27 = scalar_lea.vmem [#allocation2], %s1209_s17  ;;  %p2080_p11 = pnand %p1711_p7, %p36_p9 }
  0x47   : > { %s167_s28 = sshll.u32 %s160_s27, 4  ;;  %s2084_s29 = scalar_lea.sflag [#allocation3], %s156_s11  ;;  %s2078_s28 = int_to_ptr.vmem [resolvable:$true] %s167_s28 }
  0x48   : > { %s1809_s30 = scalar_lea.hbm %s2076_s26, 8192  ;;  %p1811_p0 = pneg %p2080_p11 }
  0x49   : > { %p1810_p12 = scmp.ne.s32.totalorder %s2076_s26, %s1809_s30  ;;  %s1814_s6 = scalar_lea.hbm %s2380_s0, 16384 }
  0x4a   : > { %p1815_p13 = scmp.lt.u32.totalorder %s2076_s26, %s2380_s0  ;;  %p1816_p6 = scmp.lt.u32.totalorder %s1814_s6, %s1809_s30 }
  0x4b   : > { %p1812_p1 = pnand %p1811_p0, %p1810_p12  ;;  %p1818_p3 = scmp.lt.u32.totalorder %s1809_s30, %s2076_s26 }
  0x4c   : > { %p1817_p10 = por %p1816_p6, %p1815_p13 }
  0x4d   : > { %p1813_p2 = pneg %p1812_p1 }
  0x4e   : > { %p1819_p7 = por %p1818_p3, %p1817_p10 }
  0x50   : > { %p1820_p9 = pnand %p1819_p7, %p1813_p2 }
  0x52   : > { %1823 = shalt.err (!%p1820_p9)
}
  0x53   : > { %s1824_s11 = scalar_lea.vmem %s2078_s28, 8192  ;;  %s1915_s21 = smov [#allocation2]  }
  0x54   : > { %p1825_p12 = scmp.ne.s32.totalorder %s2078_s28, %s1824_s11  ;;  %s1829_s24 = sshll.u32 %s1915_s21, 4  ;;  %s1830_s24 = int_to_ptr.vmem [resolvable:$false] %s1829_s24 }
  0x55   : > { %s1831_s27 = scalar_lea.vmem %s1830_s24, 16384  ;;  %p1832_p4 = scmp.lt.s32.totalorder %s2078_s28, %s1830_s24 }
  0x56   : > { %p1827_p1 = pnand %p1825_p12, %p1811_p0  ;;  %p1833_p13 = scmp.lt.s32.totalorder %s1831_s27, %s1824_s11 }
  0x58   : > { %p1828_p5 = pneg %p1827_p1  ;;  %p1834_p6 = por %p1833_p13, %p1832_p4 }
  0x5a   : > { %p1835_p10 = pnand %p1834_p6, %p1828_p5 }
  0x5c   : > { %1838 = shalt.err (!%p1835_p10)
}
  0x5d   : > { %1704 = dma.hbm_to_vmem [thread:$0]  (!%p2080_p11), %s2076_s26, 8192, %s2078_s28, %s2084_s29, %s1913_s7, %s1913_s7, %s1914_s8  }
  0x5e   : > { %179 = sbr.rel (%p1979_p8) target bundleno = 408 (0x198), region = 32  ;;  %s2118_s30 = sand.u32 (!%p1979_p8), 1, %s1901_s13  }
  0x5f   : > { %s1213_s4 = sshll.u32 (!%p1979_p8), %s2118_s30, 9  ;;  %s182_s23 = scalar_lea.sflag (!%p1979_p8), [#allocation3], %s2118_s30 }
  0x60   : > { %s2122_s6 = scalar_lea.vmem (!%p1979_p8), [#allocation2], %s1213_s4  ;;  %p2394_p4 = scmp.ne.s32.totalorder (!%p1979_p8), %s2387_s18, 0 }
  0x65   : > { %1884 = dma.done.wait (%p2394_p4), %s182_s23, 8192  }
  0x66   : > { %1886 = vsyncadd (%p2394_p4), %s182_s23, 4294959104  ;;  %p2395_p5 = scmp.eq.s32.totalorder %s1960_s16, 0 }
  0x68   : > { %1888 = dma.done.wait (%p2395_p5), [#allocation6], 528   ;;  %p2396_p8 = pmov %p2395_p5 }
  0x69   : > { %v315_v0 = vld [vmem:[#allocation5] sm:$0xff]  ;;  %v316_v1 = vld [vmem:[#allocation5 + $0x8] sm:$0xff]  ;;  %v317_v2 = vld [vmem:[#allocation5 + $0x10] sm:$0xff]  ;;  %vm328_vm0 = vcmask 261120   ;;  %s1216_s18 = sshll.u32 %s2118_s30, 8  ;;  %s1384_s7 = sshll.u32 %s1960_s16, 12 }
  0x6a   : > { %1890 = vsyncadd (%p2396_p8), [#allocation6], 4294966768  ;;  %v319_v3 = vpack.c.bf16 %v316_v1, %v315_v0  ;;  %v318_v4 = vld [vmem:[#allocation5 + $0x18] sm:$0xff]  ;;  %v219_v5 = vld [vmem:[%s2122_s6] sm:$0xff]  ;;  %s2239_s20 = scalar_lea.vmem [#allocation8], %s1216_s18  ;;  %s2330_s16 = scalar_lea.hbm %s2383_s3, %s1384_s7 }
  0x6b   : > { %v220_v6 = vld [vmem:[%s2122_s6 + $0x8] sm:$0xff]  ;;  %v320_v7 = vpack.c.bf16 %v318_v4, %v317_v2  ;;  %v251_v9 = vld [vmem:[%s2122_s6 + $0x100] sm:$0xff]  ;;  %v221_v12 = vld [vmem:[%s2122_s6 + $0x10] sm:$0xff]  ;;  %s1112_s8 = sshll.u32 %s2239_s20, 4  ;;  %s1099_s22 = scalar_lea.sflag [#allocation4], %s2118_s30  ;;  %s2332_s8 = int_to_ptr.vmem [resolvable:$true] %s1112_s8 }
  0x6c   : > { %v283_v8 = vpack.c.bf16 %v220_v6, %v219_v5  ;;  %v252_v10 = vld [vmem:[%s2122_s6 + $0x108] sm:$0xff]  ;;  %1610 = vmatprep.subr.bf16.mxu0 %v319_v3  ;;  %1678 = vmatprep.subr.bf16.mxu1 %v319_v3  ;;  %v222_v13 = vld [vmem:[%s2122_s6 + $0x18] sm:$0xff]  ;;  %v253_v14 = vld [vmem:[%s2122_s6 + $0x110] sm:$0xff]  ;;  %s1839_s29 = scalar_lea.vmem %s2332_s8, 4096  ;;  %p2397_p0 = scmp.ne.s32.totalorder %s2392_s9, 0 }
  0x6d   : > { %v299_v11 = vpack.c.bf16 %v252_v10, %v251_v9  ;;  %1611 = vmatpush3.bf16.msra.mxu0 %v319_v3  ;;  %1680 = vmatpush3.bf16.msra.mxu1 %v319_v3  ;;  %v254_v15 = vld [vmem:[%s2122_s6 + $0x118] sm:$0xff]  ;;  %v223_v16 = vld [vmem:[%s2122_s6 + $0x20] sm:$0xff]  ;;  %v224_v17 = vld [vmem:[%s2122_s6 + $0x28] sm:$0xff]  ;;  %v284_v20 = vpack.c.bf16 %v222_v13, %v221_v12  ;;  %p1840_p11 = scmp.ne.s32.totalorder %s2332_s8, %s1839_s29  ;;  %s1916_s17 = smov [#allocation8]  }
  0x6e   : > { %1612 = vmatprep.subr.bf16.mxu0 %v320_v7  ;;  %1679 = vmatprep.subr.bf16.mxu1 %v320_v7  ;;  %v255_v18 = vld [vmem:[%s2122_s6 + $0x120] sm:$0xff]  ;;  %v256_v19 = vld [vmem:[%s2122_s6 + $0x128] sm:$0xff]  ;;  %v300_v21 = vpack.c.bf16 %v254_v15, %v253_v14  ;;  %v285_v22 = vpack.c.bf16 %v224_v17, %v223_v16  ;;  %v225_v24 = vld [vmem:[%s2122_s6 + $0x30] sm:$0xff]  ;;  %s1843_s25 = sshll.u32 %s1916_s17, 4  ;;  %s1844_s25 = int_to_ptr.vmem [resolvable:$false] %s1843_s25 }
  0x6f   : > { %1614 = vmatprep.mubr.msk.bf16.mxu0 %vm328_vm0, %v283_v8  ;;  %1646 = vmatprep.mubr.msk.bf16.mxu1 %vm328_vm0, %v299_v11  ;;  %v301_v23 = vpack.c.bf16 %v256_v19, %v255_v18  ;;  %v226_v25 = vld [vmem:[%s2122_s6 + $0x38] sm:$0xff]  ;;  %v257_v26 = vld [vmem:[%s2122_s6 + $0x130] sm:$0xff]  ;;  %v227_v28 = vld [vmem:[%s2122_s6 + $0x40] sm:$0xff]  ;;  %p1841_p2 = pnand %p1840_p11, %p2397_p0  ;;  %s1845_s11 = scalar_lea.vmem %s1844_s25, 8192 }
  0x70   : > { %v258_v27 = vld [vmem:[%s2122_s6 + $0x138] sm:$0xff]  ;;  %v228_v29 = vld [vmem:[%s2122_s6 + $0x48] sm:$0xff]  ;;  %v259_v30 = vld [vmem:[%s2122_s6 + $0x140] sm:$0xff]  ;;  %v286_v32 = vpack.c.bf16 %v226_v25, %v225_v24  ;;  %p1846_p7 = scmp.lt.s32.totalorder %s2332_s8, %s1844_s25  ;;  %p1847_p9 = scmp.lt.s32.totalorder %s1845_s11, %s1839_s29 }
  0x71   : > { %1613 = vmatpush3.bf16.msra.mxu0 %v320_v7  ;;  %1681 = vmatpush3.bf16.msra.mxu1 %v320_v7  ;;  %v260_v31 = vld [vmem:[%s2122_s6 + $0x148] sm:$0xff]  ;;  %v302_v33 = vpack.c.bf16 %v258_v27, %v257_v26  ;;  %v287_v34 = vpack.c.bf16 %v228_v29, %v227_v28  ;;  %v229_v36 = vld [vmem:[%s2122_s6 + $0x50] sm:$0xff]  ;;  %v230_v37 = vld [vmem:[%s2122_s6 + $0x58] sm:$0xff]  ;;  %p1842_p3 = pneg %p1841_p2 }
  0x72   : > { %v303_v35 = vpack.c.bf16 %v260_v31, %v259_v30  ;;  %v261_v38 = vld [vmem:[%s2122_s6 + $0x150] sm:$0xff]  ;;  %v262_v39 = vld [vmem:[%s2122_s6 + $0x158] sm:$0xff]  ;;  %v231_v40 = vld [vmem:[%s2122_s6 + $0x60] sm:$0xff]  ;;  %v288_v44 = vpack.c.bf16 %v230_v37, %v229_v36  ;;  %p1848_p12 = por %p1847_p9, %p1846_p7 }
  0x73   : > { %v232_v41 = vld [vmem:[%s2122_s6 + $0x68] sm:$0xff]  ;;  %v263_v42 = vld [vmem:[%s2122_s6 + $0x160] sm:$0xff]  ;;  %v304_v45 = vpack.c.bf16 %v262_v39, %v261_v38  ;;  %v233_v48 = vld [vmem:[%s2122_s6 + $0x70] sm:$0xff] }
  0x74   : > { %1615 = vmatmul.mubr.msk.bf16.vlgmr.msra.gmra.mrb[0].mxu0 %vm328_vm0, %v284_v20  ;;  %1647 = vmatmul.mubr.msk.bf16.vlgmr.msra.gmra.mrb[0].mxu1 %vm328_vm0, %v300_v21  ;;  %v264_v43 = vld [vmem:[%s2122_s6 + $0x168] sm:$0xff]  ;;  %v289_v46 = vpack.c.bf16 %v232_v41, %v231_v40  ;;  %v234_v49 = vld [vmem:[%s2122_s6 + $0x78] sm:$0xff]  ;;  %v265_v50 = vld [vmem:[%s2122_s6 + $0x170] sm:$0xff]  ;;  %p1849_p1 = pnand %p1848_p12, %p1842_p3 }
  0x75   : > { %1618 = vmatprep.mubr.msk.bf16.mxu0 %vm328_vm0, %v285_v22  ;;  %1650 = vmatprep.mubr.msk.bf16.mxu1 %vm328_vm0, %v301_v23  ;;  %v305_v47 = vpack.c.bf16 %v264_v43, %v263_v42  ;;  %v266_v51 = vld [vmem:[%s2122_s6 + $0x178] sm:$0xff]  ;;  %v235_v52 = vld [vmem:[%s2122_s6 + $0x80] sm:$0xff]  ;;  %v236_v53 = vld [vmem:[%s2122_s6 + $0x88] sm:$0xff]  ;;  %v290_v56 = vpack.c.bf16 %v234_v49, %v233_v48 }
  0x76   : > { %v267_v54 = vld [vmem:[%s2122_s6 + $0x180] sm:$0xff]  ;;  %v268_v55 = vld [vmem:[%s2122_s6 + $0x188] sm:$0xff]  ;;  %v306_v57 = vpack.c.bf16 %v266_v51, %v265_v50  ;;  %v291_v58 = vpack.c.bf16 %v236_v53, %v235_v52  ;;  %v237_v60 = vld [vmem:[%s2122_s6 + $0x90] sm:$0xff] }
  0x77   : > { %v307_v59 = vpack.c.bf16 %v268_v55, %v267_v54  ;;  %v238_v61 = vld [vmem:[%s2122_s6 + $0x98] sm:$0xff]  ;;  %v269_v62 = vld [vmem:[%s2122_s6 + $0x190] sm:$0xff]  ;;  %v239_v0 = vld [vmem:[%s2122_s6 + $0xa0] sm:$0xff] }
  0x78   : > { %v270_v63 = vld [vmem:[%s2122_s6 + $0x198] sm:$0xff]  ;;  %v240_v1 = vld [vmem:[%s2122_s6 + $0xa8] sm:$0xff]  ;;  %v271_v2 = vld [vmem:[%s2122_s6 + $0x1a0] sm:$0xff]  ;;  %v292_v4 = vpack.c.bf16 %v238_v61, %v237_v60 }
  0x79   : > { %v272_v3 = vld [vmem:[%s2122_s6 + $0x1a8] sm:$0xff]  ;;  %v308_v5 = vpack.c.bf16 %v270_v63, %v269_v62  ;;  %v293_v6 = vpack.c.bf16 %v240_v1, %v239_v0  ;;  %v241_v8 = vld [vmem:[%s2122_s6 + $0xb0] sm:$0xff]  ;;  %v242_v9 = vld [vmem:[%s2122_s6 + $0xb8] sm:$0xff] }
  0x7a   : > { %v309_v7 = vpack.c.bf16 %v272_v3, %v271_v2  ;;  %v273_v10 = vld [vmem:[%s2122_s6 + $0x1b0] sm:$0xff]  ;;  %v274_v11 = vld [vmem:[%s2122_s6 + $0x1b8] sm:$0xff]  ;;  %v243_v12 = vld [vmem:[%s2122_s6 + $0xc0] sm:$0xff]  ;;  %v294_v16 = vpack.c.bf16 %v242_v9, %v241_v8 }
  0x7b   : > { %v244_v13 = vld [vmem:[%s2122_s6 + $0xc8] sm:$0xff]  ;;  %v275_v14 = vld [vmem:[%s2122_s6 + $0x1c0] sm:$0xff]  ;;  %v310_v17 = vpack.c.bf16 %v274_v11, %v273_v10  ;;  %v245_v20 = vld [vmem:[%s2122_s6 + $0xd0] sm:$0xff] }
  0x7c   : > { %1619 = vmatmul.mubr.msk.bf16.gmra.mrb[4].mxu0 %vm328_vm0, %v286_v32  ;;  %1651 = vmatmul.mubr.msk.bf16.gmra.mrb[4].mxu1 %vm328_vm0, %v302_v33  ;;  %v276_v15 = vld [vmem:[%s2122_s6 + $0x1c8] sm:$0xff]  ;;  %v295_v18 = vpack.c.bf16 %v244_v13, %v243_v12  ;;  %v246_v21 = vld [vmem:[%s2122_s6 + $0xd8] sm:$0xff]  ;;  %v277_v22 = vld [vmem:[%s2122_s6 + $0x1d0] sm:$0xff] }
  0x7d   : > { %1622 = vmatprep.mubr.msk.bf16.mxu0 %vm328_vm0, %v287_v34  ;;  %1654 = vmatprep.mubr.msk.bf16.mxu1 %vm328_vm0, %v303_v35  ;;  %v311_v19 = vpack.c.bf16 %v276_v15, %v275_v14  ;;  %v278_v23 = vld [vmem:[%s2122_s6 + $0x1d8] sm:$0xff]  ;;  %v247_v24 = vld [vmem:[%s2122_s6 + $0xe0] sm:$0xff]  ;;  %v248_v25 = vld [vmem:[%s2122_s6 + $0xe8] sm:$0xff]  ;;  %v296_v28 = vpack.c.bf16 %v246_v21, %v245_v20 }
  0x7e   : > { %v279_v26 = vld [vmem:[%s2122_s6 + $0x1e0] sm:$0xff]  ;;  %v280_v27 = vld [vmem:[%s2122_s6 + $0x1e8] sm:$0xff]  ;;  %v312_v29 = vpack.c.bf16 %v278_v23, %v277_v22  ;;  %v297_v30 = vpack.c.bf16 %v248_v25, %v247_v24  ;;  %v249_v32 = vld [vmem:[%s2122_s6 + $0xf0] sm:$0xff] }
  0x7f   : > { %v313_v31 = vpack.c.bf16 %v280_v27, %v279_v26  ;;  %v250_v33 = vld [vmem:[%s2122_s6 + $0xf8] sm:$0xff]  ;;  %v281_v34 = vld [vmem:[%s2122_s6 + $0x1f0] sm:$0xff]  ;;  %v2228_v38 = vld [vmem:[#allocation7] ss:$0 sm:$0xff] }
  0x80   : > { %v282_v35 = vld [vmem:[%s2122_s6 + $0x1f8] sm:$0xff]  ;;  %v298_v36 = vpack.c.bf16 %v250_v33, %v249_v32 }
  0x81   : > { %v314_v37 = vpack.c.bf16 %v282_v35, %v281_v34 }
  0x84   : > { %1623 = vmatmul.mubr.msk.bf16.gmra.mrb[8].mxu0 %vm328_vm0, %v288_v44  ;;  %1655 = vmatmul.mubr.msk.bf16.gmra.mrb[8].mxu1 %vm328_vm0, %v304_v45 }
  0x85   : > { %1626 = vmatprep.mubr.msk.bf16.mxu0 %vm328_vm0, %v289_v46  ;;  %1658 = vmatprep.mubr.msk.bf16.mxu1 %vm328_vm0, %v305_v47 }
  0x8c   : > { %1627 = vmatmul.mubr.msk.bf16.gmra.mrb[12].mxu0 %vm328_vm0, %v290_v56  ;;  %1659 = vmatmul.mubr.msk.bf16.gmra.mrb[12].mxu1 %vm328_vm0, %v306_v57 }
  0x8d   : > { %1630 = vmatprep.mubr.msk.bf16.mxu0 %vm328_vm0, %v291_v58  ;;  %1662 = vmatprep.mubr.msk.bf16.mxu1 %vm328_vm0, %v307_v59 }
  0x94   : > { %1631 = vmatmul.mubr.msk.bf16.gmra.mrb[16].mxu0 %vm328_vm0, %v292_v4  ;;  %1663 = vmatmul.mubr.msk.bf16.gmra.mrb[16].mxu1 %vm328_vm0, %v308_v5 }
  0x95   : > { %1634 = vmatprep.mubr.msk.bf16.mxu0 %vm328_vm0, %v293_v6  ;;  %1666 = vmatprep.mubr.msk.bf16.mxu1 %vm328_vm0, %v309_v7 }
  0x9c   : > { %1635 = vmatmul.mubr.msk.bf16.gmra.mrb[20].mxu0 %vm328_vm0, %v294_v16  ;;  %1667 = vmatmul.mubr.msk.bf16.gmra.mrb[20].mxu1 %vm328_vm0, %v310_v17 }
  0x9d   : > { %1638 = vmatprep.mubr.msk.bf16.mxu0 %vm328_vm0, %v295_v18  ;;  %1670 = vmatprep.mubr.msk.bf16.mxu1 %vm328_vm0, %v311_v19 }
  0xa4   : > { %1639 = vmatmul.mubr.msk.bf16.gmra.mrb[24].mxu0 %vm328_vm0, %v296_v28  ;;  %1671 = vmatmul.mubr.msk.bf16.gmra.mrb[24].mxu1 %vm328_vm0, %v312_v29 }
  0xa5   : > { %1642 = vmatprep.mubr.msk.bf16.mxu0 %vm328_vm0, %v297_v30  ;;  %1674 = vmatprep.mubr.msk.bf16.mxu1 %vm328_vm0, %v313_v31 }
  0xac   : > { %1643 = vmatmul.mubr.msk.bf16.gmra.mrb[28].mxu0 %vm328_vm0, %v298_v36  ;;  %1675 = vmatmul.mubr.msk.bf16.gmra.mrb[28].mxu1 %vm328_vm0, %v314_v37 }
 0x147   : > { %v1616_v39 = vpop.f32.mrb[0].mxu0  ;;  %v1648_v40 = vpop.f32.mrb[0].mxu1 }
 0x148   : > { %v468_v41 = vadd.f32 %v1616_v39, %v2228_v38  ;;  %v596_v42 = vadd.f32 %v1648_v40, %v2228_v38  ;;  %v459_v43 = vpop.f32.mrb[1].mxu0  ;;  %v587_v44 = vpop.f32.mrb[1].mxu1 }
 0x149   : > { %v460_v45 = vadd.f32 %v2228_v38, %v459_v43  ;;  %v588_v46 = vadd.f32 %v2228_v38, %v587_v44  ;;  %v1617_v47 = vpop.f32.mrb[2].mxu0  ;;  %v1649_v48 = vpop.f32.mrb[2].mxu1 }
 0x14a   : > { %v471_v49 = vadd.f32 %v1617_v47, %v2228_v38  ;;  %v599_v50 = vadd.f32 %v1649_v48, %v2228_v38  ;;  %v462_v51 = vpop.f32.mrb[3].mxu0  ;;  %v590_v52 = vpop.f32.mrb[3].mxu1  ;;  %v716_v55 = vmax.f32 %v468_v41, 0.0  ;;  %v748_v56 = vmax.f32 %v596_v42, 0.0 }
 0x14b   : > { %v463_v53 = vadd.f32 %v2228_v38, %v462_v51  ;;  %v591_v54 = vadd.f32 %v2228_v38, %v590_v52  ;;  %v714_v59 = vmax.f32 %v460_v45, 0.0  ;;  %v746_v60 = vmax.f32 %v588_v46, 0.0 }
 0x14c   : > { %v717_v57 = vmax.f32 %v471_v49, 0.0  ;;  %v749_v58 = vmax.f32 %v599_v50, 0.0 }
 0x14d   : > { %v715_v61 = vmax.f32 %v463_v53, 0.0  ;;  %v747_v62 = vmax.f32 %v591_v54, 0.0 }
 0x14e   : > { %v1393_v63 = vpack.c.bf16 %v717_v57, %v716_v55  ;;  %v1473_v0 = vpack.c.bf16 %v749_v58, %v748_v56 }
 0x14f   : > { %v1388_v1 = vpack.c.bf16 %v715_v61, %v714_v59  ;;  %v1468_v2 = vpack.c.bf16 %v747_v62, %v746_v60  ;;  %v1620_v3 = vpop.f32.mrb[4].mxu0  ;;  %v1652_v4 = vpop.f32.mrb[4].mxu1 }
 0x150   : > { %1545 = vst [vmem:[%s2239_s20 + $0x8] sm:$0xff] %v1393_v63   ;;  %1561 = vst [vmem:[%s2239_s20 + $0x88] sm:$0xff] %v1473_v0   ;;  %v484_v5 = vadd.f32 %v1620_v3, %v2228_v38  ;;  %v612_v6 = vadd.f32 %v1652_v4, %v2228_v38  ;;  %v475_v7 = vpop.f32.mrb[5].mxu0  ;;  %v603_v8 = vpop.f32.mrb[5].mxu1 }
 0x151   : > { %1389 = vst [vmem:[%s2239_s20] sm:$0xff] %v1388_v1   ;;  %1560 = vst [vmem:[%s2239_s20 + $0x80] sm:$0xff] %v1468_v2   ;;  %v476_v9 = vadd.f32 %v2228_v38, %v475_v7  ;;  %v604_v10 = vadd.f32 %v2228_v38, %v603_v8  ;;  %v1621_v11 = vpop.f32.mrb[6].mxu0  ;;  %v1653_v12 = vpop.f32.mrb[6].mxu1 }
 0x152   : > { %v487_v13 = vadd.f32 %v1621_v11, %v2228_v38  ;;  %v615_v14 = vadd.f32 %v1653_v12, %v2228_v38  ;;  %v478_v15 = vpop.f32.mrb[7].mxu0  ;;  %v606_v16 = vpop.f32.mrb[7].mxu1  ;;  %v720_v19 = vmax.f32 %v484_v5, 0.0  ;;  %v752_v20 = vmax.f32 %v612_v6, 0.0 }
 0x153   : > { %v479_v17 = vadd.f32 %v2228_v38, %v478_v15  ;;  %v607_v18 = vadd.f32 %v2228_v38, %v606_v16  ;;  %v718_v23 = vmax.f32 %v476_v9, 0.0  ;;  %v750_v24 = vmax.f32 %v604_v10, 0.0 }
 0x154   : > { %v721_v21 = vmax.f32 %v487_v13, 0.0  ;;  %v753_v22 = vmax.f32 %v615_v14, 0.0 }
 0x155   : > { %v719_v25 = vmax.f32 %v479_v17, 0.0  ;;  %v751_v26 = vmax.f32 %v607_v18, 0.0 }
 0x156   : > { %v1403_v27 = vpack.c.bf16 %v721_v21, %v720_v19  ;;  %v1483_v28 = vpack.c.bf16 %v753_v22, %v752_v20 }
 0x157   : > { %v1398_v29 = vpack.c.bf16 %v719_v25, %v718_v23  ;;  %v1478_v30 = vpack.c.bf16 %v751_v26, %v750_v24  ;;  %v1624_v31 = vpop.f32.mrb[8].mxu0  ;;  %v1656_v32 = vpop.f32.mrb[8].mxu1 }
 0x158   : > { %1547 = vst [vmem:[%s2239_s20 + $0x18] sm:$0xff] %v1403_v27   ;;  %1563 = vst [vmem:[%s2239_s20 + $0x98] sm:$0xff] %v1483_v28   ;;  %v500_v33 = vadd.f32 %v1624_v31, %v2228_v38  ;;  %v628_v34 = vadd.f32 %v1656_v32, %v2228_v38  ;;  %v491_v35 = vpop.f32.mrb[9].mxu0  ;;  %v619_v36 = vpop.f32.mrb[9].mxu1 }
 0x159   : > { %1546 = vst [vmem:[%s2239_s20 + $0x10] sm:$0xff] %v1398_v29   ;;  %1562 = vst [vmem:[%s2239_s20 + $0x90] sm:$0xff] %v1478_v30   ;;  %v492_v37 = vadd.f32 %v2228_v38, %v491_v35  ;;  %v620_v39 = vadd.f32 %v2228_v38, %v619_v36  ;;  %v1625_v40 = vpop.f32.mrb[10].mxu0  ;;  %v1657_v41 = vpop.f32.mrb[10].mxu1 }
 0x15a   : > { %v503_v42 = vadd.f32 %v1625_v40, %v2228_v38  ;;  %v631_v43 = vadd.f32 %v1657_v41, %v2228_v38  ;;  %v494_v44 = vpop.f32.mrb[11].mxu0  ;;  %v622_v45 = vpop.f32.mrb[11].mxu1  ;;  %v724_v48 = vmax.f32 %v500_v33, 0.0  ;;  %v756_v49 = vmax.f32 %v628_v34, 0.0 }
 0x15b   : > { %v495_v46 = vadd.f32 %v2228_v38, %v494_v44  ;;  %v623_v47 = vadd.f32 %v2228_v38, %v622_v45  ;;  %v722_v52 = vmax.f32 %v492_v37, 0.0  ;;  %v754_v53 = vmax.f32 %v620_v39, 0.0 }
 0x15c   : > { %v725_v50 = vmax.f32 %v503_v42, 0.0  ;;  %v757_v51 = vmax.f32 %v631_v43, 0.0 }
 0x15d   : > { %v723_v54 = vmax.f32 %v495_v46, 0.0  ;;  %v755_v55 = vmax.f32 %v623_v47, 0.0 }
 0x15e   : > { %v1413_v56 = vpack.c.bf16 %v725_v50, %v724_v48  ;;  %v1493_v57 = vpack.c.bf16 %v757_v51, %v756_v49 }
 0x15f   : > { %v1408_v58 = vpack.c.bf16 %v723_v54, %v722_v52  ;;  %v1488_v59 = vpack.c.bf16 %v755_v55, %v754_v53  ;;  %v1628_v60 = vpop.f32.mrb[12].mxu0  ;;  %v1660_v61 = vpop.f32.mrb[12].mxu1 }
 0x160   : > { %1549 = vst [vmem:[%s2239_s20 + $0x28] sm:$0xff] %v1413_v56   ;;  %1565 = vst [vmem:[%s2239_s20 + $0xa8] sm:$0xff] %v1493_v57   ;;  %v516_v62 = vadd.f32 %v1628_v60, %v2228_v38  ;;  %v644_v63 = vadd.f32 %v1660_v61, %v2228_v38  ;;  %v507_v0 = vpop.f32.mrb[13].mxu0  ;;  %v635_v1 = vpop.f32.mrb[13].mxu1 }
 0x161   : > { %1548 = vst [vmem:[%s2239_s20 + $0x20] sm:$0xff] %v1408_v58   ;;  %1564 = vst [vmem:[%s2239_s20 + $0xa0] sm:$0xff] %v1488_v59   ;;  %v508_v2 = vadd.f32 %v2228_v38, %v507_v0  ;;  %v636_v3 = vadd.f32 %v2228_v38, %v635_v1  ;;  %v1629_v4 = vpop.f32.mrb[14].mxu0  ;;  %v1661_v5 = vpop.f32.mrb[14].mxu1 }
 0x162   : > { %v519_v6 = vadd.f32 %v1629_v4, %v2228_v38  ;;  %v647_v7 = vadd.f32 %v1661_v5, %v2228_v38  ;;  %v510_v8 = vpop.f32.mrb[15].mxu0  ;;  %v638_v9 = vpop.f32.mrb[15].mxu1  ;;  %v728_v12 = vmax.f32 %v516_v62, 0.0  ;;  %v760_v13 = vmax.f32 %v644_v63, 0.0 }
 0x163   : > { %v511_v10 = vadd.f32 %v2228_v38, %v510_v8  ;;  %v639_v11 = vadd.f32 %v2228_v38, %v638_v9  ;;  %v726_v16 = vmax.f32 %v508_v2, 0.0  ;;  %v758_v17 = vmax.f32 %v636_v3, 0.0 }
 0x164   : > { %v729_v14 = vmax.f32 %v519_v6, 0.0  ;;  %v761_v15 = vmax.f32 %v647_v7, 0.0 }
 0x165   : > { %v727_v18 = vmax.f32 %v511_v10, 0.0  ;;  %v759_v19 = vmax.f32 %v639_v11, 0.0 }
 0x166   : > { %v1423_v20 = vpack.c.bf16 %v729_v14, %v728_v12  ;;  %v1503_v21 = vpack.c.bf16 %v761_v15, %v760_v13 }
 0x167   : > { %v1418_v22 = vpack.c.bf16 %v727_v18, %v726_v16  ;;  %v1498_v23 = vpack.c.bf16 %v759_v19, %v758_v17  ;;  %v1632_v24 = vpop.f32.mrb[16].mxu0  ;;  %v1664_v25 = vpop.f32.mrb[16].mxu1 }
 0x168   : > { %1551 = vst [vmem:[%s2239_s20 + $0x38] sm:$0xff] %v1423_v20   ;;  %1567 = vst [vmem:[%s2239_s20 + $0xb8] sm:$0xff] %v1503_v21   ;;  %v532_v26 = vadd.f32 %v1632_v24, %v2228_v38  ;;  %v660_v27 = vadd.f32 %v1664_v25, %v2228_v38  ;;  %v523_v28 = vpop.f32.mrb[17].mxu0  ;;  %v651_v29 = vpop.f32.mrb[17].mxu1 }
 0x169   : > { %1550 = vst [vmem:[%s2239_s20 + $0x30] sm:$0xff] %v1418_v22   ;;  %1566 = vst [vmem:[%s2239_s20 + $0xb0] sm:$0xff] %v1498_v23   ;;  %v524_v30 = vadd.f32 %v2228_v38, %v523_v28  ;;  %v652_v31 = vadd.f32 %v2228_v38, %v651_v29  ;;  %v1633_v32 = vpop.f32.mrb[18].mxu0  ;;  %v1665_v33 = vpop.f32.mrb[18].mxu1 }
 0x16a   : > { %v535_v34 = vadd.f32 %v1633_v32, %v2228_v38  ;;  %v663_v35 = vadd.f32 %v1665_v33, %v2228_v38  ;;  %v526_v36 = vpop.f32.mrb[19].mxu0  ;;  %v654_v37 = vpop.f32.mrb[19].mxu1  ;;  %v732_v41 = vmax.f32 %v532_v26, 0.0  ;;  %v764_v42 = vmax.f32 %v660_v27, 0.0 }
 0x16b   : > { %v527_v39 = vadd.f32 %v2228_v38, %v526_v36  ;;  %v655_v40 = vadd.f32 %v2228_v38, %v654_v37  ;;  %v730_v45 = vmax.f32 %v524_v30, 0.0  ;;  %v762_v46 = vmax.f32 %v652_v31, 0.0 }
 0x16c   : > { %v733_v43 = vmax.f32 %v535_v34, 0.0  ;;  %v765_v44 = vmax.f32 %v663_v35, 0.0 }
 0x16d   : > { %v731_v47 = vmax.f32 %v527_v39, 0.0  ;;  %v763_v48 = vmax.f32 %v655_v40, 0.0 }
 0x16e   : > { %v1433_v49 = vpack.c.bf16 %v733_v43, %v732_v41  ;;  %v1513_v50 = vpack.c.bf16 %v765_v44, %v764_v42 }
 0x16f   : > { %v1428_v51 = vpack.c.bf16 %v731_v47, %v730_v45  ;;  %v1508_v52 = vpack.c.bf16 %v763_v48, %v762_v46  ;;  %v1636_v53 = vpop.f32.mrb[20].mxu0  ;;  %v1668_v54 = vpop.f32.mrb[20].mxu1 }
 0x170   : > { %1553 = vst [vmem:[%s2239_s20 + $0x48] sm:$0xff] %v1433_v49   ;;  %1569 = vst [vmem:[%s2239_s20 + $0xc8] sm:$0xff] %v1513_v50   ;;  %v548_v55 = vadd.f32 %v1636_v53, %v2228_v38  ;;  %v676_v56 = vadd.f32 %v1668_v54, %v2228_v38  ;;  %v539_v57 = vpop.f32.mrb[21].mxu0  ;;  %v667_v58 = vpop.f32.mrb[21].mxu1 }
 0x171   : > { %1552 = vst [vmem:[%s2239_s20 + $0x40] sm:$0xff] %v1428_v51   ;;  %1568 = vst [vmem:[%s2239_s20 + $0xc0] sm:$0xff] %v1508_v52   ;;  %v540_v59 = vadd.f32 %v2228_v38, %v539_v57  ;;  %v668_v60 = vadd.f32 %v2228_v38, %v667_v58  ;;  %v1637_v61 = vpop.f32.mrb[22].mxu0  ;;  %v1669_v62 = vpop.f32.mrb[22].mxu1 }
 0x172   : > { %v551_v63 = vadd.f32 %v1637_v61, %v2228_v38  ;;  %v679_v0 = vadd.f32 %v1669_v62, %v2228_v38  ;;  %v542_v1 = vpop.f32.mrb[23].mxu0  ;;  %v670_v2 = vpop.f32.mrb[23].mxu1  ;;  %v736_v5 = vmax.f32 %v548_v55, 0.0  ;;  %v768_v6 = vmax.f32 %v676_v56, 0.0 }
 0x173   : > { %v543_v3 = vadd.f32 %v2228_v38, %v542_v1  ;;  %v671_v4 = vadd.f32 %v2228_v38, %v670_v2  ;;  %v734_v9 = vmax.f32 %v540_v59, 0.0  ;;  %v766_v10 = vmax.f32 %v668_v60, 0.0 }
 0x174   : > { %v737_v7 = vmax.f32 %v551_v63, 0.0  ;;  %v769_v8 = vmax.f32 %v679_v0, 0.0 }
 0x175   : > { %v735_v11 = vmax.f32 %v543_v3, 0.0  ;;  %v767_v12 = vmax.f32 %v671_v4, 0.0 }
 0x176   : > { %v1443_v13 = vpack.c.bf16 %v737_v7, %v736_v5  ;;  %v1523_v14 = vpack.c.bf16 %v769_v8, %v768_v6 }
 0x177   : > { %v1438_v15 = vpack.c.bf16 %v735_v11, %v734_v9  ;;  %v1518_v16 = vpack.c.bf16 %v767_v12, %v766_v10  ;;  %v1640_v17 = vpop.f32.mrb[24].mxu0  ;;  %v1672_v18 = vpop.f32.mrb[24].mxu1 }
 0x178   : > { %1555 = vst [vmem:[%s2239_s20 + $0x58] sm:$0xff] %v1443_v13   ;;  %1571 = vst [vmem:[%s2239_s20 + $0xd8] sm:$0xff] %v1523_v14   ;;  %v564_v19 = vadd.f32 %v1640_v17, %v2228_v38  ;;  %v692_v20 = vadd.f32 %v1672_v18, %v2228_v38  ;;  %v555_v21 = vpop.f32.mrb[25].mxu0  ;;  %v683_v22 = vpop.f32.mrb[25].mxu1 }
 0x179   : > { %1554 = vst [vmem:[%s2239_s20 + $0x50] sm:$0xff] %v1438_v15   ;;  %1570 = vst [vmem:[%s2239_s20 + $0xd0] sm:$0xff] %v1518_v16   ;;  %v556_v23 = vadd.f32 %v2228_v38, %v555_v21  ;;  %v684_v24 = vadd.f32 %v2228_v38, %v683_v22  ;;  %v1641_v25 = vpop.f32.mrb[26].mxu0  ;;  %v1673_v26 = vpop.f32.mrb[26].mxu1 }
 0x17a   : > { %v567_v27 = vadd.f32 %v1641_v25, %v2228_v38  ;;  %v695_v28 = vadd.f32 %v1673_v26, %v2228_v38  ;;  %v558_v29 = vpop.f32.mrb[27].mxu0  ;;  %v686_v30 = vpop.f32.mrb[27].mxu1  ;;  %v740_v33 = vmax.f32 %v564_v19, 0.0  ;;  %v772_v34 = vmax.f32 %v692_v20, 0.0 }
 0x17b   : > { %v559_v31 = vadd.f32 %v2228_v38, %v558_v29  ;;  %v687_v32 = vadd.f32 %v2228_v38, %v686_v30  ;;  %v738_v37 = vmax.f32 %v556_v23, 0.0  ;;  %v770_v39 = vmax.f32 %v684_v24, 0.0 }
 0x17c   : > { %v741_v35 = vmax.f32 %v567_v27, 0.0  ;;  %v773_v36 = vmax.f32 %v695_v28, 0.0 }
 0x17d   : > { %v739_v40 = vmax.f32 %v559_v31, 0.0  ;;  %v771_v41 = vmax.f32 %v687_v32, 0.0 }
 0x17e   : > { %v1453_v42 = vpack.c.bf16 %v741_v35, %v740_v33  ;;  %v1533_v43 = vpack.c.bf16 %v773_v36, %v772_v34 }
 0x17f   : > { %v1448_v44 = vpack.c.bf16 %v739_v40, %v738_v37  ;;  %v1528_v45 = vpack.c.bf16 %v771_v41, %v770_v39  ;;  %v1644_v46 = vpop.f32.mrb[28].mxu0  ;;  %v1676_v47 = vpop.f32.mrb[28].mxu1 }
 0x180   : > { %1557 = vst [vmem:[%s2239_s20 + $0x68] sm:$0xff] %v1453_v42   ;;  %1573 = vst [vmem:[%s2239_s20 + $0xe8] sm:$0xff] %v1533_v43   ;;  %v580_v48 = vadd.f32 %v1644_v46, %v2228_v38  ;;  %v708_v49 = vadd.f32 %v1676_v47, %v2228_v38  ;;  %v571_v50 = vpop.f32.mrb[29].mxu0  ;;  %v699_v51 = vpop.f32.mrb[29].mxu1 }
 0x181   : > { %1556 = vst [vmem:[%s2239_s20 + $0x60] sm:$0xff] %v1448_v44   ;;  %1572 = vst [vmem:[%s2239_s20 + $0xe0] sm:$0xff] %v1528_v45   ;;  %v572_v52 = vadd.f32 %v2228_v38, %v571_v50  ;;  %v700_v53 = vadd.f32 %v2228_v38, %v699_v51  ;;  %v1645_v54 = vpop.f32.mrb[30].mxu0  ;;  %v1677_v55 = vpop.f32.mrb[30].mxu1 }
 0x182   : > { %v583_v56 = vadd.f32 %v1645_v54, %v2228_v38  ;;  %v711_v57 = vadd.f32 %v1677_v55, %v2228_v38  ;;  %v574_v58 = vpop.f32.mrb[31].mxu0  ;;  %v702_v59 = vpop.f32.mrb[31].mxu1  ;;  %v744_v62 = vmax.f32 %v580_v48, 0.0  ;;  %v776_v63 = vmax.f32 %v708_v49, 0.0 }
 0x183   : > { %v575_v60 = vadd.f32 %v2228_v38, %v574_v58  ;;  %v703_v61 = vadd.f32 %v2228_v38, %v702_v59  ;;  %v742_v2 = vmax.f32 %v572_v52, 0.0  ;;  %v774_v3 = vmax.f32 %v700_v53, 0.0 }
 0x184   : > { %v745_v0 = vmax.f32 %v583_v56, 0.0  ;;  %v777_v1 = vmax.f32 %v711_v57, 0.0 }
 0x185   : > { %v743_v4 = vmax.f32 %v575_v60, 0.0  ;;  %v775_v5 = vmax.f32 %v703_v61, 0.0 }
 0x186   : > { %v1463_v6 = vpack.c.bf16 %v745_v0, %v744_v62  ;;  %v1543_v7 = vpack.c.bf16 %v777_v1, %v776_v63 }
 0x187   : > { %v1458_v38 = vpack.c.bf16 %v743_v4, %v742_v2  ;;  %v1538_v8 = vpack.c.bf16 %v775_v5, %v774_v3 }
 0x188   : > { %1559 = vst [vmem:[%s2239_s20 + $0x78] sm:$0xff] %v1463_v6   ;;  %1575 = vst [vmem:[%s2239_s20 + $0xf8] sm:$0xff] %v1543_v7  }
 0x189   : > { %1558 = vst [vmem:[%s2239_s20 + $0x70] sm:$0xff] %v1458_v38   ;;  %1574 = vst [vmem:[%s2239_s20 + $0xf0] sm:$0xff] %v1538_v8  }
 0x18a   : > { %1852 = shalt.err (!%p1849_p1)
}
 0x18b   : > { %s1853_s21 = scalar_lea.hbm %s2330_s16, 4096  ;;  %s1857_s4 = scalar_lea.hbm %s2383_s3, 8192 }
 0x18c   : > { %p1854_p13 = scmp.ne.s32.totalorder %s2330_s16, %s1853_s21  ;;  %p1858_p4 = scmp.lt.u32.totalorder %s2330_s16, %s2383_s3 }
 0x18d   : > { %p1859_p5 = scmp.lt.u32.totalorder %s1857_s4, %s1853_s21  ;;  %p1861_p11 = scmp.lt.u32.totalorder %s1853_s21, %s2330_s16 }
 0x18e   : > { %p1855_p6 = pnand %p1854_p13, %p2397_p0 }
 0x18f   : > { %p1860_p8 = por %p1859_p5, %p1858_p4 }
 0x190   : > { %p1856_p10 = pneg %p1855_p6 }
 0x191   : > { %p1862_p2 = por %p1861_p11, %p1860_p8 }
 0x193   : > { %p1863_p3 = pnand %p1862_p2, %p1856_p10 }
 0x195   : > { %1866 = shalt.err (!%p1863_p3)
}
 0x196   : > { %s1917_s18 = smov 64   ;;  %s1918_s20 = smov 4  }
 0x197   : > { %1692 = dma.vmem_to_hbm [thread:$0]  (%p2397_p0), %s2332_s8, 4096, %s2330_s16, %s1099_s22, %s1917_s18, %s1917_s18, %s1918_s20  }
 0x198 PF: > { %s1127_s7 = sand.u32 1, %s1897_s12   ;;  %p2398_p7 = scmp.ne.s32.totalorder %s2388_s19, 0 }
 0x199   : > { %p2399_p9 = scmp.ge.s32.totalorder %s1909_s15, 2  ;;  %s1128_s26 = scalar_lea.sflag [#allocation4], %s1127_s7 }
 0x19b   : > { %p1706_p12 = pnand %p2399_p9, %p2398_p7 }
 0x19d   : > { %1892 = dma.done.wait (!%p1706_p12), %s1128_s26, 4096  }
 0x19e   : > { %1894 = vsyncadd (!%p1706_p12), %s1128_s26, 4294963200  ;;  %p17_p1 = scmp.ge.s32.totalorder %s2053_s5, 4   ;;  %s2400_s12 = smov %s1901_s13 }
 0x19f   : > { %s2401_s13 = smov %s1905_s14  ;;  %s2402_s14 = smov %s2069_s10 }
 0x1a0   : > { %s2403_s15 = smov %s2053_s5  ;;  %19 = sbr.rel (!%p17_p1) target bundleno = 6 (0x6), region = 85 }
 0x1a7   :  { %1133 = vsyncpa [#allocation3], 1 }
 0x1a8   :  { %1135 = vsyncpa [#allocation3 + $0x1], 1 }
 0x1a9   :  { %1136 = vsyncpa [#allocation6], 1 }
 0x1aa   :  { %1137 = vsyncpa [#allocation4], 1 }
 0x1ab   :  { %1139 = vsyncpa [#allocation4 + $0x1], 1 }

</bundles_post_ra>
